<compile_context>
chip_gen: v7x
topology: tpu7x:2x2x1
jax: 0.10.0
libtpu: 0.0.40
codegen_flags: <defaults>
</compile_context>

<pallas_src>
import functools

import jax
import jax.numpy as jnp
from jax import lax
from jax.experimental import pallas as pl
from jax.experimental.pallas import tpu as pltpu


def _model_with_loss_kernel(x_ref, t_ref, w1_ref, b1_ref, w2_ref, b2_ref,
                            loss_ref, acc_ref, *,
                            true_batch, tile_rows, n_total, needs_mask):
    # x: (TB, D_in) f32, t: (TB, D_out) f32, w1: (D_in, H) bf16, b1: (1, H) f32,
    # w2: (H, D_out) bf16, b2: (1, D_out) f32, loss: (1,1) f32 SMEM,
    # acc: (1,1) f32 SMEM scratch (persists across grid steps).
    i = pl.program_id(0)

    @pl.when(i == 0)
    def _init():
        acc_ref[0, 0] = jnp.float32(0.0)

    # Layer 1: Linear + ReLU (bf16 operands, f32 accumulation on the MXU).
    x = x_ref[...].astype(jnp.bfloat16)
    h = jnp.dot(x, w1_ref[...], preferred_element_type=jnp.float32) + b1_ref[...]
    h = jnp.maximum(h, 0.0)

    # Layer 2: Linear.
    y = jnp.dot(h.astype(jnp.bfloat16), w2_ref[...],
                preferred_element_type=jnp.float32) + b2_ref[...]

    diff = y - t_ref[...]
    if needs_mask:
        # Zero out padded tail rows so they don't contribute to the sum.
        rows = i * tile_rows + lax.broadcasted_iota(jnp.int32, diff.shape, 0)
        diff = jnp.where(rows < true_batch, diff, 0.0)

    # Per-tile partial sum of squared errors into the scalar accumulator.
    acc_ref[0, 0] = acc_ref[0, 0] + jnp.sum(diff * diff)

    @pl.when(i == pl.num_programs(0) - 1)
    def _finalize():
        # Divide by the TRUE element count (B * D_out), not the padded count.
        loss_ref[0, 0] = acc_ref[0, 0] / jnp.float32(n_total)


def model_with_loss(data, target, w1, b1, w2, b2, *, max_tile_rows=1024):
    """Computes MSELoss(MLP(data), target) as a single fused, tiled Pallas kernel.

    data:   (B, D_in)  float32
    target: (B, D_out) float32
    w1: (D_in, H), b1: (H,), w2: (H, D_out), b2: (D_out,)   (stored as (in, out))
    Returns a scalar float32 loss.
    """
    B, D_in = data.shape
    _, D_out = target.shape
    H = w1.shape[1]

    # Batch tile: as large as practical (multiple of 8), capped for VMEM headroom.
    tile_rows = min(max_tile_rows, ((B + 7) // 8) * 8)
    b_padded = ((B + tile_rows - 1) // tile_rows) * tile_rows
    if b_padded != B:
        data = jnp.pad(data, ((0, b_padded - B), (0, 0)))
        target = jnp.pad(target, ((0, b_padded - B), (0, 0)))
    num_tiles = b_padded // tile_rows

    # bf16 weights (halves weight bytes, full-rate MXU); f32 biases.
    w1_bf = w1.astype(jnp.bfloat16)
    w2_bf = w2.astype(jnp.bfloat16)
    b1_2d = b1.reshape(1, -1).astype(jnp.float32)
    b2_2d = b2.reshape(1, -1).astype(jnp.float32)

    kernel = functools.partial(
        _model_with_loss_kernel,
        true_batch=B,
        tile_rows=tile_rows,
        n_total=B * D_out,
        needs_mask=(b_padded != B),
    )

    flops = 2 * b_padded * (D_in * H + H * D_out)
    bytes_accessed = (
        b_padded * D_in * 4 + b_padded * D_out * 4       # activations + targets (f32)
        + (D_in * H + H * D_out) * 2                     # bf16 weights
        + (H + D_out) * 4 + 4                            # biases + scalar out
    )

    loss = pl.pallas_call(
        kernel,
        out_shape=jax.ShapeDtypeStruct((1, 1), jnp.float32),
        grid=(num_tiles,),
        in_specs=[
            pl.BlockSpec((tile_rows, D_in), lambda i: (i, 0)),    # x tile
            pl.BlockSpec((tile_rows, D_out), lambda i: (i, 0)),   # target tile
            pl.BlockSpec((D_in, H), lambda i: (0, 0)),            # w1 (resident)
            pl.BlockSpec((1, H), lambda i: (0, 0)),               # b1 (resident)
            pl.BlockSpec((H, D_out), lambda i: (0, 0)),           # w2 (resident)
            pl.BlockSpec((1, D_out), lambda i: (0, 0)),           # b2 (resident)
        ],
        out_specs=pl.BlockSpec((1, 1), lambda i: (0, 0), memory_space=pltpu.SMEM),
        scratch_shapes=[pltpu.SMEM((1, 1), jnp.float32)],
        compiler_params=pltpu.CompilerParams(
            dimension_semantics=("arbitrary",),          # batch axis carries the reduction
            vmem_limit_bytes=32 * 1024 * 1024,
        ),
        cost_estimate=pl.CostEstimate(
            flops=flops, transcendentals=0, bytes_accessed=bytes_accessed),
    )(data, target, w1_bf, b1_2d, w2_bf, b2_2d)
    return loss[0, 0]


def reference_loss(data, target, w1, b1, w2, b2):
    h = jnp.maximum(data @ w1 + b1, 0.0)
    y = h @ w2 + b2
    return jnp.mean((y - target) ** 2)


if __name__ == "__main__":
    D_IN, H, D_OUT = 32, 64, 16

    key = jax.random.PRNGKey(0)
    k_x, k_t, k_w1, k_b1, k_w2, k_b2 = jax.random.split(key, 6)

    # Deterministic parameter init (Kaiming-ish scaling), stored as (in, out).
    w1 = jax.random.normal(k_w1, (D_IN, H), dtype=jnp.float32) * (1.0 / jnp.sqrt(D_IN))
    b1 = jax.random.normal(k_b1, (H,), dtype=jnp.float32) * 0.01
    w2 = jax.random.normal(k_w2, (H, D_OUT), dtype=jnp.float32) * (1.0 / jnp.sqrt(H))
    b2 = jax.random.normal(k_b2, (D_OUT,), dtype=jnp.float32) * 0.01

    fused = jax.jit(model_with_loss)

    # Case 1: batch divisible by the tile (no masking path).
    B = 8
    data = jax.random.normal(k_x, (B, D_IN), dtype=jnp.float32)
    target = jax.random.normal(k_t, (B, D_OUT), dtype=jnp.float32)
    loss = jax.block_until_ready(fused(data, target, w1, b1, w2, b2))
    ref = reference_loss(data, target, w1, b1, w2, b2)
    # bf16 matmul operands -> compare against f32 reference at bf16-level tolerance.
    assert jnp.allclose(loss, ref, rtol=2e-2, atol=2e-2), (loss, ref)

    # Case 2: batch NOT a multiple of the tile -> exercises tail-row masking.
    B2 = 13
    data2 = jax.random.normal(k_x, (B2, D_IN), dtype=jnp.float32)
    target2 = jax.random.normal(k_t, (B2, D_OUT), dtype=jnp.float32)
    loss2 = jax.block_until_ready(fused(data2, target2, w1, b1, w2, b2))
    ref2 = reference_loss(data2, target2, w1, b1, w2, b2)
    assert jnp.allclose(loss2, ref2, rtol=2e-2, atol=2e-2), (loss2, ref2)

    print("KERNEL_OK")
</pallas_src>

<mosaic_0001>
module attributes {stable_mosaic.version = 11 : i64} {
  func.func @_model_with_loss_kernel(%arg0: i32, %arg1: memref<8x32xf32, #tpu.memory_space<vmem>>, %arg2: memref<8x16xf32, #tpu.memory_space<vmem>>, %arg3: memref<32x64xbf16, #tpu.memory_space<vmem>>, %arg4: memref<1x64xf32, #tpu.memory_space<vmem>>, %arg5: memref<64x16xbf16, #tpu.memory_space<vmem>>, %arg6: memref<1x16xf32, #tpu.memory_space<vmem>>, %arg7: memref<1x1xf32, #tpu.memory_space<smem>>, %arg8: memref<1x1xf32, #tpu.memory_space<smem>>) attributes {dimension_semantics = [#tpu.dimension_semantics<arbitrary>], iteration_bounds = array<i64: 1>, scalar_prefetch = 0 : i64, scratch_operands = 1 : i64, tpu.core_type = #tpu.core_type<tc>, window_params = [{transform_indices = @transform_0, window_bounds = array<i64: 8, 32>}, {transform_indices = @transform_1, window_bounds = array<i64: 8, 16>}, {pipeline_mode = #tpu.pipeline_mode<synchronous>, transform_indices = @transform_2, window_bounds = array<i64: 32, 64>}, {pipeline_mode = #tpu.pipeline_mode<synchronous>, transform_indices = @transform_3, window_bounds = array<i64: 1, 64>}, {pipeline_mode = #tpu.pipeline_mode<synchronous>, transform_indices = @transform_4, window_bounds = array<i64: 64, 16>}, {pipeline_mode = #tpu.pipeline_mode<synchronous>, transform_indices = @transform_5, window_bounds = array<i64: 1, 16>}, {transform_indices = @transform_6, window_bounds = array<i64: 1, 1>}]} {
    %c0_i32 = arith.constant 0 : i32
    %0 = arith.cmpi eq, %arg0, %c0_i32 : i32
    %1 = arith.extui %0 : i1 to i32
    %c0_i32_0 = arith.constant 0 : i32
    %2 = arith.cmpi ne, %1, %c0_i32_0 : i32
    scf.if %2 {
      %cst_21 = arith.constant 0.000000e+00 : f32
      %c0_22 = arith.constant 0 : index
      %c0_23 = arith.constant 0 : index
      %31 = memref.load %arg8[%c0_22, %c0_23] : memref<1x1xf32, #tpu.memory_space<smem>>
      memref.store %cst_21, %arg8[%c0_22, %c0_23] : memref<1x1xf32, #tpu.memory_space<smem>>
    } else {
    }
    %c0 = arith.constant 0 : index
    %c0_1 = arith.constant 0 : index
    %3 = vector.load %arg1[%c0, %c0_1] : memref<8x32xf32, #tpu.memory_space<vmem>>, vector<8x32xf32>
    %4 = arith.truncf %3 : vector<8x32xf32> to vector<8x32xbf16>
    %c0_2 = arith.constant 0 : index
    %c0_3 = arith.constant 0 : index
    %5 = vector.load %arg3[%c0_2, %c0_3] : memref<32x64xbf16, #tpu.memory_space<vmem>>, vector<32x64xbf16>
    %cst = arith.constant dense<0.000000e+00> : vector<8x64xf32>
    %6 = tpu.matmul %4, %5, %cst {dimension_numbers = #tpu.dot_dimension_numbers<[1], [0], [0], [1], [0, 0, 1, 1], [], []>} : vector<8x32xbf16>, vector<32x64xbf16>, vector<8x64xf32> -> vector<8x64xf32>
    %c0_4 = arith.constant 0 : index
    %c0_5 = arith.constant 0 : index
    %7 = vector.load %arg4[%c0_4, %c0_5] : memref<1x64xf32, #tpu.memory_space<vmem>>, vector<1x64xf32>
    %8 = vector.broadcast %7 : vector<1x64xf32> to vector<8x64xf32>
    %9 = arith.addf %6, %8 : vector<8x64xf32>
    %cst_6 = arith.constant 0.000000e+00 : f32
    %10 = vector.broadcast %cst_6 : f32 to vector<8x64xf32>
    %11 = arith.maximumf %9, %10 : vector<8x64xf32>
    %12 = arith.truncf %11 : vector<8x64xf32> to vector<8x64xbf16>
    %c0_7 = arith.constant 0 : index
    %c0_8 = arith.constant 0 : index
    %13 = vector.load %arg5[%c0_7, %c0_8] : memref<64x16xbf16, #tpu.memory_space<vmem>>, vector<64x16xbf16>
    %cst_9 = arith.constant dense<0.000000e+00> : vector<8x16xf32>
    %14 = tpu.matmul %12, %13, %cst_9 {dimension_numbers = #tpu.dot_dimension_numbers<[1], [0], [0], [1], [0, 0, 1, 1], [], []>} : vector<8x64xbf16>, vector<64x16xbf16>, vector<8x16xf32> -> vector<8x16xf32>
    %c0_10 = arith.constant 0 : index
    %c0_11 = arith.constant 0 : index
    %15 = vector.load %arg6[%c0_10, %c0_11] : memref<1x16xf32, #tpu.memory_space<vmem>>, vector<1x16xf32>
    %16 = vector.broadcast %15 : vector<1x16xf32> to vector<8x16xf32>
    %17 = arith.addf %14, %16 : vector<8x16xf32>
    %c0_12 = arith.constant 0 : index
    %c0_13 = arith.constant 0 : index
    %18 = vector.load %arg2[%c0_12, %c0_13] : memref<8x16xf32, #tpu.memory_space<vmem>>, vector<8x16xf32>
    %19 = arith.subf %17, %18 : vector<8x16xf32>
    %c0_14 = arith.constant 0 : index
    %c0_15 = arith.constant 0 : index
    %20 = memref.load %arg8[%c0_14, %c0_15] : memref<1x1xf32, #tpu.memory_space<smem>>
    %21 = arith.mulf %19, %19 : vector<8x16xf32>
    %22 = vector.shape_cast %21 : vector<8x16xf32> to vector<1x8x16xf32>
    %cst_16 = arith.constant dense<0.000000e+00> : vector<1xf32>
    %23 = vector.multi_reduction <add>, %22, %cst_16 [1, 2] : vector<1x8x16xf32> to vector<1xf32>
    %24 = vector.shape_cast %23 : vector<1xf32> to vector<1x1x1xf32>
    %25 = vector.extract %24[0, 0, 0] : f32 from vector<1x1x1xf32>
    %26 = arith.addf %20, %25 : f32
    %c0_17 = arith.constant 0 : index
    %c0_18 = arith.constant 0 : index
    %27 = memref.load %arg8[%c0_17, %c0_18] : memref<1x1xf32, #tpu.memory_space<smem>>
    memref.store %26, %arg8[%c0_17, %c0_18] : memref<1x1xf32, #tpu.memory_space<smem>>
    %c0_i32_19 = arith.constant 0 : i32
    %28 = arith.cmpi eq, %arg0, %c0_i32_19 : i32
    %29 = arith.extui %28 : i1 to i32
    %c0_i32_20 = arith.constant 0 : i32
    %30 = arith.cmpi ne, %29, %c0_i32_20 : i32
    scf.if %30 {
      %c0_21 = arith.constant 0 : index
      %c0_22 = arith.constant 0 : index
      %31 = memref.load %arg8[%c0_21, %c0_22] : memref<1x1xf32, #tpu.memory_space<smem>>
      %cst_23 = arith.constant 1.280000e+02 : f32
      %32 = arith.divf %31, %cst_23 : f32
      %c0_24 = arith.constant 0 : index
      %c0_25 = arith.constant 0 : index
      %33 = memref.load %arg7[%c0_24, %c0_25] : memref<1x1xf32, #tpu.memory_space<smem>>
      memref.store %32, %arg7[%c0_24, %c0_25] : memref<1x1xf32, #tpu.memory_space<smem>>
    } else {
    }
    return
  }
  func.func @transform_0(%arg0: i32) -> (i32, i32) {
    %c0_i32 = arith.constant 0 : i32
    %c0_i32_0 = arith.constant 0 : i32
    return %arg0, %c0_i32 : i32, i32
  }
  func.func @transform_1(%arg0: i32) -> (i32, i32) {
    %c0_i32 = arith.constant 0 : i32
    %c0_i32_0 = arith.constant 0 : i32
    return %arg0, %c0_i32 : i32, i32
  }
  func.func @transform_2(%arg0: i32) -> (i32, i32) {
    %c0_i32 = arith.constant 0 : i32
    %c0_i32_0 = arith.constant 0 : i32
    %c0_i32_1 = arith.constant 0 : i32
    return %c0_i32, %c0_i32_0 : i32, i32
  }
  func.func @transform_3(%arg0: i32) -> (i32, i32) {
    %c0_i32 = arith.constant 0 : i32
    %c0_i32_0 = arith.constant 0 : i32
    %c0_i32_1 = arith.constant 0 : i32
    return %c0_i32, %c0_i32_0 : i32, i32
  }
  func.func @transform_4(%arg0: i32) -> (i32, i32) {
    %c0_i32 = arith.constant 0 : i32
    %c0_i32_0 = arith.constant 0 : i32
    %c0_i32_1 = arith.constant 0 : i32
    return %c0_i32, %c0_i32_0 : i32, i32
  }
  func.func @transform_5(%arg0: i32) -> (i32, i32) {
    %c0_i32 = arith.constant 0 : i32
    %c0_i32_0 = arith.constant 0 : i32
    %c0_i32_1 = arith.constant 0 : i32
    return %c0_i32, %c0_i32_0 : i32, i32
  }
  func.func @transform_6(%arg0: i32) -> (i32, i32) {
    %c0_i32 = arith.constant 0 : i32
    %c0_i32_0 = arith.constant 0 : i32
    %c0_i32_1 = arith.constant 0 : i32
    return %c0_i32, %c0_i32_0 : i32, i32
  }
}

</mosaic_0001>

<bundles_post_ra>
// kernel: model_with_loss.1
= control target key start
LH: loop header
LB: loop body
LE: loop exit
PB: predicated region body
PF: predicated region fallthrough
CT: control target
= control target key end

     0   :  { %v286_v1 = vmov 0.0   ;;  %vm287_vm0 = vmmov 0   ;;  %vm56_vm1 = vcmask 261120   ;;  %s366_s0 = inlined_call_operand.vmem [shape: f32[8,32], index: 0, kind: input, shape index: {}]   ;;  %s367_s1 = inlined_call_operand.vmem [shape: f32[8,16], index: 1, kind: input, shape index: {}]   ;;  %s368_s2 = inlined_call_operand.vmem [shape: bf16[32,64], index: 2, kind: input, shape index: {}]   ;;  %s369_s3 = inlined_call_operand.vmem [shape: f32[1,64], index: 3, kind: input, shape index: {}]   ;;  %s370_s4 = inlined_call_operand.vmem [shape: bf16[64,16], index: 4, kind: input, shape index: {}]   ;;  %s371_s5 = inlined_call_operand.vmem [shape: f32[1,16], index: 5, kind: input, shape index: {}]   ;;  %s372_s6 = inlined_call_operand.hbm [shape: f32[1,1], index: 6, kind: output, shape index: {}]  }
   0x1   :  { %v268_v0 = vld [vmem:[%s368_s2] sm:$0xff]   ;;  %243 = vmatprep.subr.bf16.mxu0 %v286_v1  ;;  %v269_v2 = vld [vmem:[%s368_s2 + $0x8] sm:$0xff]   ;;  %251 = vmatprep.subr.bf16.mxu1 %v286_v1 }
   0x2   :  { %244 = vmatpush3.bf16.msra.mxu0 %v268_v0  ;;  %247 = vmatprep.mubr.msk.bf16.mxu0 %vm287_vm0, %v286_v1  ;;  %v31_v3 = vld [vmem:[%s366_s0] sm:$0xff]  ;;  %v271_v5 = vld [vmem:[%s370_s4 + $0x8] sm:$0xff]  }
   0x3   :  { %245 = vmatprep.subr.bf16.mxu0 %v286_v1  ;;  %v270_v4 = vld [vmem:[%s370_s4] sm:$0xff]   ;;  %259 = vmatprep.mubr.msk.bf16.mxu1 %vm287_vm0, %v286_v1  ;;  %v32_v6 = vpack.c.bf16 %v31_v3, %v31_v3 }
   0x4   :  { %252 = vmatpush3.bf16.msra.mxu1 %v270_v4 }
   0x5   :  { %253 = vmatprep.subr.bf16.mxu1 %v286_v1 }
   0x6   :  { %246 = vmatpush3.bf16.msra.mxu0 %v269_v2 }
   0x7   :  { %11 = vsyncpa [#allocation4], 0  ;;  %v272_v7 = vld [vmem:[%s370_s4 + $0x10] sm:$0xff]   ;;  %v273_v8 = vld [vmem:[%s370_s4 + $0x18] sm:$0xff]   ;;  %vm141_vm2 = vcmask 523264   ;;  %vm189_vm3 = vcmask 130048  }
   0x8   :  { %254 = vmatpush3.bf16.msra.mxu1 %v271_v5  ;;  %v225_v9 = vld [vmem:[%s369_s3] ss:$0 sm:$0xff]  ;;  %s274_s15 = scalar_lea.hbm %s372_s6, 16 }
   0x9   :  { %248 = vmatmul.mubr.msk.bf16.vlgmr.msra.gmra.mrb[0].mxu0 %vm56_vm1, %v32_v6  ;;  %255 = vmatprep.subr.bf16.mxu1 %v286_v1  ;;  %v229_v17 = vld [vmem:[%s371_s5] ss:$0 sm:$0xff]  ;;  %p275_p0 = scmp.ne.s32.totalorder %s372_s6, %s274_s15  ;;  %p278_p1 = scmp.lt.u32.totalorder %s274_s15, %s372_s6 }
   0xa   :  { %v185_v19 = vld [vmem:[%s367_s1] sm:$0xff] }
   0xb   :  { %p280_p2 = pnand %p278_p1, %p275_p0 }
   0xc   :  { %256 = vmatpush3.bf16.msra.mxu1 %v272_v7 }
   0xd   :  { %257 = vmatprep.subr.bf16.mxu1 %v286_v1 }
  0x10   :  { %258 = vmatpush3.bf16.msra.mxu1 %v273_v8 }
  0xdc   :  { %v94_v10 = vpop.f32.mrb[0].mxu0 }
  0xdd   :  { %v95_v11 = vadd.f32 %v225_v9, %v94_v10  ;;  %v249_v12 = vpop.f32.mrb[1].mxu0 }
  0xde   :  { %v97_v13 = vpop.f32.mrb[2].mxu0 }
  0xdf   :  { %v100_v14 = vmax.f32 %v95_v11, 0.0  ;;  %v250_v15 = vpop.f32.mrb[3].mxu0 }
  0xe1   :  { %v101_v16 = vpack.c.bf16 %v100_v14, %v100_v14 }
  0xe3   :  { %260 = vmatmul.mubr.msk.bf16.vlgmr.msra.gmra.mrb[0].mxu1 %vm141_vm2, %v101_v16 }
 0x1b6   :  { %v179_v18 = vpop.f32.mrb[0].mxu1 }
 0x1b7   :  { %v180_v20 = vadd.f32 %v229_v17, %v179_v18  ;;  %v261_v21 = vpop.f32.mrb[1].mxu1 }
 0x1b8   :  { %v182_v22 = vpop.f32.mrb[2].mxu1 }
 0x1b9   :  { %v262_v23 = vpop.f32.mrb[3].mxu1  ;;  %v186_v24 = vsub.f32 %v180_v20, %v185_v19 }
 0x1bb   :  { %v188_v25 = vmul.f32 %v186_v24, %v186_v24 }
 0x1bd   :  { %v190_v26 = vsel %vm189_vm3, %v188_v25, 0.0 }
 0x1be   :  { %191 = vadd.xlane.f32.xlu0 %v190_v26 }
 0x24b   :  { %v192_v27 = vpop.xlane.xlu0 %191 }
 0x24c   :  { %v193_v28 = vrot.slane %v192_v27, 4 }
 0x24e   :  { %v194_v29 = vadd.f32 %v193_v28, %v192_v27 }
 0x250   :  { %v195_v30 = vrot.slane %v194_v29, 2 }
 0x252   :  { %v196_v31 = vadd.f32 %v195_v30, %v194_v29 }
 0x254   :  { %v197_v32 = vrot.slane %v196_v31, 1 }
 0x256   :  { %v198_v33 = vadd.f32 %v197_v32, %v196_v31 }
 0x258   :  { %263 = vpush %v198_v33 }
 0x289   :  { %s264_s3 = spop %263 }
 0x28a   :  { %s209_s5 = smul.f32 0.0078125, %s264_s3 }
 0x28c   :  { %211 = sst [smem:[#allocation3]] %s209_s5 }
 0x28d   :  { %283 = shalt.err (!%p280_p2)
}
 0x28e   :  { %s288_s20 = smov [#allocation3]  }
 0x28f   :  { %219 = dma.smem_to_hbm %s288_s20, 16, %s372_s6, [#allocation4]  }
 0x290   :  { %284 = dma.done.wait [#allocation4], 16  }
 0x291   :  { %285 = vsyncadd [#allocation4], 4294967280 }
 0x292   :  { %223 = sfence }
 0x293   :  { %224 = vsyncpa [#allocation4], 1 }

</bundles_post_ra>
